<compile_context>
chip_gen: v7x
topology: tpu7x:2x2x1
jax: 0.10.0
libtpu: 0.0.40
codegen_flags: <defaults>
</compile_context>

<pallas_src>
import functools

import jax
import jax.numpy as jnp
from jax import lax
from jax.experimental import pallas as pl
from jax.experimental.pallas import tpu as pltpu

_MIB = 1024 * 1024
_MXU_MIN_CHANNELS = 64   # switch to the MXU formulation at/above this channel count

# VPU-path sub-tiles: live accumulator pair = 2 * (8/8)*(256/128) = 4 vregs.
_SUB_C = 8       # output-channel sub-tile (one sublane group)
_SUB_L = 256     # mode sub-tile (two 128-lane vregs)
_CIN_UNROLL = 4  # unroll factor for the visible Cin loop


# ---------------------------------------------------------------------------
# Hardware-aware sizing helpers
# ---------------------------------------------------------------------------
def _vmem_limit_bytes():
    """Generation-aware scoped-VMEM request.

    v5e/v6e have 128 MiB of physical VMEM (scoped defaults are only 16/32 MiB);
    v7x has 64 MiB per TensorCore.  Request half the physical capacity, clamped
    to [32 MiB, 96 MiB]; fall back to a 32 MiB request (safe everywhere) if the
    query is unavailable.
    """
    try:
        cap = int(pltpu.get_tpu_info().vmem_capacity_bytes)
    except Exception:
        cap = 64 * _MIB
    return max(32 * _MIB, min(cap // 2, 96 * _MIB))


def _round_up(x, m):
    return pl.cdiv(x, m) * m


def _divisor_tiles(dim, unit):
    """Legal block sizes for a sublane/lane-mapped axis of length `dim`:
    multiples of `unit` that divide `dim`, plus `dim` itself (a full-dim block
    is always legal).  Returned descending."""
    ts = {dim}
    for t in range(unit, dim, unit):
        if dim % t == 0:
            ts.add(t)
    return sorted(ts, reverse=True)


def _pick_vpu_tiles(B, Cin, Cout, Mpad, vmem_limit):
    """Largest (tb, tc, tl) whose double-buffered re|im working set fits VMEM."""
    budget = int(0.7 * vmem_limit)

    tb_all = _divisor_tiles(B, 8)
    tc_all = _divisor_tiles(Cout, 8)
    tb_opts = [t for t in tb_all if t <= 16] or [tb_all[-1]]
    tc_opts = [t for t in tc_all if t <= 128] or [tc_all[-1]]
    tl_opts = sorted({t for t in (Mpad, 1024, 512, 256, 128)
                      if t <= Mpad and Mpad % t == 0}, reverse=True)

    def working_set(tb, tc, tl):
        # 4 bytes * 2 (re|im) * 2 (double buffered) for activations, weights, outputs.
        return 16 * tl * (Cin * tb + Cin * tc + tb * tc)

    for tl in tl_opts:
        for tc in tc_opts:
            for tb in tb_opts:
                if working_set(tb, tc, tl) <= budget:
                    return tb, tc, tl
    return tb_opts[-1], tc_opts[-1], tl_opts[-1]


# ---------------------------------------------------------------------------
# Small-channel (VPU) path
# ---------------------------------------------------------------------------
def _vpu_mix_kernel(a_re_ref, a_im_ref, w_re_ref, w_im_ref, o_re_ref, o_im_ref):
    """Per-mode complex channel mixing, elementwise (VPU) formulation.

    a_*: (Cin, tb, tl)  truncated spectrum (contracted channel on the untiled
                        leading axis -> per-i loads are address offsets)
    w_*: (Cin, tc, tl)  spectral weights
    o_*: (tb, tc, tl)   out[b, o, m] = sum_i a[i, b, m] * w[i, o, m]  (complex)
    """
    cin, tb, _ = a_re_ref.shape
    _, tc, tl = o_re_ref.shape

    for b in range(tb):                                 # static, tb is small
        for c0 in range(0, tc, _SUB_C):
            cs = min(_SUB_C, tc - c0)
            for l0 in range(0, tl, _SUB_L):
                ls = min(_SUB_L, tl - l0)

                def cin_step(i, carry):
                    acc_re, acc_im = carry
                    # Dynamic index i on the untiled leading axis: free offset.
                    ar = a_re_ref[i, pl.ds(b, 1), pl.ds(l0, ls)]     # (1, ls)
                    ai = a_im_ref[i, pl.ds(b, 1), pl.ds(l0, ls)]
                    wr = w_re_ref[i, pl.ds(c0, cs), pl.ds(l0, ls)]   # (cs, ls)
                    wi = w_im_ref[i, pl.ds(c0, cs), pl.ds(l0, ls)]
                    # (1, ls) broadcasts against (cs, ls): one sublane splat.
                    acc_re = acc_re + (ar * wr - ai * wi)
                    acc_im = acc_im + (ar * wi + ai * wr)
                    return acc_re, acc_im

                acc0 = (jnp.zeros((cs, ls), jnp.float32),
                        jnp.zeros((cs, ls), jnp.float32))
                acc_re, acc_im = lax.fori_loop(
                    0, cin, cin_step, acc0, unroll=min(cin, _CIN_UNROLL))

                o_re_ref[b, pl.ds(c0, cs), pl.ds(l0, ls)] = acc_re
                o_im_ref[b, pl.ds(c0, cs), pl.ds(l0, ls)] = acc_im


def _spectral_mix_vpu(a, w, Mpad, vmem_limit):
    """a: (B, Cin, S) c64, w: (Cin, Cout, S) c64 -> (o_re, o_im): (B, Cout, S) f32."""
    B, Cin, S = a.shape
    Cout = w.shape[1]

    pad = ((0, 0), (0, 0), (0, Mpad - S))
    # Activations go to (Cin, B, Mpad): contracted channel on the leading axis.
    a_t = jnp.transpose(a, (1, 0, 2))
    a_re = jnp.pad(jnp.real(a_t).astype(jnp.float32), pad)
    a_im = jnp.pad(jnp.imag(a_t).astype(jnp.float32), pad)
    w_re = jnp.pad(jnp.real(w).astype(jnp.float32), pad)
    w_im = jnp.pad(jnp.imag(w).astype(jnp.float32), pad)

    tb, tc, tl = _pick_vpu_tiles(B, Cin, Cout, Mpad, vmem_limit)
    n_b, n_c, n_l = B // tb, Cout // tc, Mpad // tl

    # Pick the innermost (residency) axis by which operand would be re-streamed.
    acts_bytes = 8 * B * Cin * Mpad          # re+im f32
    wts_bytes = 8 * Cin * Cout * Mpad
    batch_inner = (wts_bytes + n_c * acts_bytes) <= (acts_bytes + n_b * wts_bytes)
    if batch_inner:
        grid = (n_c, n_l, n_b)               # weights stay resident across b
        a_map = lambda c, l, b: (0, b, l)
        w_map = lambda c, l, b: (0, c, l)
        o_map = lambda c, l, b: (b, c, l)
    else:
        grid = (n_b, n_l, n_c)               # activations stay resident across c
        a_map = lambda b, l, c: (0, b, l)
        w_map = lambda b, l, c: (0, c, l)
        o_map = lambda b, l, c: (b, c, l)

    o_re, o_im = pl.pallas_call(
        _vpu_mix_kernel,
        out_shape=(jax.ShapeDtypeStruct((B, Cout, Mpad), jnp.float32),
                   jax.ShapeDtypeStruct((B, Cout, Mpad), jnp.float32)),
        grid=grid,
        in_specs=[
            pl.BlockSpec((Cin, tb, tl), a_map),
            pl.BlockSpec((Cin, tb, tl), a_map),
            pl.BlockSpec((Cin, tc, tl), w_map),
            pl.BlockSpec((Cin, tc, tl), w_map),
        ],
        out_specs=(pl.BlockSpec((tb, tc, tl), o_map),
                   pl.BlockSpec((tb, tc, tl), o_map)),
        compiler_params=pltpu.CompilerParams(
            # Innermost (residency) axis is 'arbitrary' so v7x megacore sharding
            # splits the outer axes and keeps the resident operand per-core.
            dimension_semantics=("parallel", "parallel", "arbitrary"),
            vmem_limit_bytes=vmem_limit,
        ),
    )(a_re, a_im, w_re, w_im)
    return o_re[:, :, :S], o_im[:, :, :S]


# ---------------------------------------------------------------------------
# Large-channel (MXU) path
# ---------------------------------------------------------------------------
def _mxu_mix_kernel(a_re_ref, a_im_ref, w_re_ref, w_im_ref, o_re_ref, o_im_ref):
    """Per-mode complex channel mixing on the MXU.

    a_*: (tm, B, Cin), w_*: (tm, Cin, Cout), o_*: (tm, B, Cout).
    Each mode is an independent (B, Cin) @ (Cin, Cout) complex matmul,
    done as 4 real f32 matmuls.
    """
    tm = a_re_ref.shape[0]

    @pl.loop(0, tm)
    def _(m):
        ar = a_re_ref[m]                     # (B, Cin) -- leading-axis offset
        ai = a_im_ref[m]
        wr = w_re_ref[m]                     # (Cin, Cout)
        wi = w_im_ref[m]
        rr = jnp.dot(ar, wr, preferred_element_type=jnp.float32)
        ii = jnp.dot(ai, wi, preferred_element_type=jnp.float32)
        ri = jnp.dot(ar, wi, preferred_element_type=jnp.float32)
        ir = jnp.dot(ai, wr, preferred_element_type=jnp.float32)
        o_re_ref[m] = rr - ii
        o_im_ref[m] = ri + ir


def _spectral_mix_mxu(a, w, Mpad, vmem_limit):
    """a: (B, Cin, S) c64, w: (Cin, Cout, S) c64 -> (o_re, o_im): (B, Cout, S) f32."""
    B, Cin, S = a.shape
    Cout = w.shape[1]

    padm = ((0, Mpad - S), (0, 0), (0, 0))
    a_t = jnp.transpose(a, (2, 0, 1))        # (S, B, Cin): channels on lanes
    w_t = jnp.transpose(w, (2, 0, 1))        # (S, Cin, Cout)
    a_re = jnp.pad(jnp.real(a_t).astype(jnp.float32), padm)
    a_im = jnp.pad(jnp.imag(a_t).astype(jnp.float32), padm)
    w_re = jnp.pad(jnp.real(w_t).astype(jnp.float32), padm)
    w_im = jnp.pad(jnp.imag(w_t).astype(jnp.float32), padm)

    per_mode = 16 * (B * Cin + Cin * Cout + B * Cout)   # re|im, double-buffered, f32
    budget = int(0.7 * vmem_limit)
    tm_opts = sorted({t for t in (Mpad, 512, 256, 128)
                      if t <= Mpad and Mpad % t == 0}, reverse=True)
    tm = next((t for t in tm_opts if t * per_mode <= budget), tm_opts[-1])

    spec_a = pl.BlockSpec((tm, B, Cin), lambda m: (m, 0, 0))
    spec_w = pl.BlockSpec((tm, Cin, Cout), lambda m: (m, 0, 0))
    spec_o = pl.BlockSpec((tm, B, Cout), lambda m: (m, 0, 0))

    o_re, o_im = pl.pallas_call(
        _mxu_mix_kernel,
        out_shape=(jax.ShapeDtypeStruct((Mpad, B, Cout), jnp.float32),
                   jax.ShapeDtypeStruct((Mpad, B, Cout), jnp.float32)),
        grid=(Mpad // tm,),
        in_specs=[spec_a, spec_a, spec_w, spec_w],
        out_specs=(spec_o, spec_o),
        compiler_params=pltpu.CompilerParams(
            dimension_semantics=("parallel",),
            vmem_limit_bytes=vmem_limit,
        ),
    )(a_re, a_im, w_re, w_im)

    o_re = jnp.transpose(o_re[:S], (1, 2, 0))            # (B, Cout, S)
    o_im = jnp.transpose(o_im[:S], (1, 2, 0))
    return o_re, o_im


# ---------------------------------------------------------------------------
# Forward pass
# ---------------------------------------------------------------------------
def spectral_conv2d(x, weights1, weights2, n_modes):
    """Forward pass of SpectralConv2d.

    x        : (B, Cin, H, W) float32   (NCHW, like PyTorch)
    weights1 : (Cin, Cout, n1, n2) complex64
    weights2 : (Cin, Cout, n1, n2) complex64
    returns  : (B, Cout, H, W) float32
    """
    n1, n2 = n_modes
    B, Cin, H, W = x.shape
    Cout = weights1.shape[1]
    Wf = W // 2 + 1

    S = 2 * n1 * n2                       # low + high frequency blocks, flattened
    # Lane-dense mode padding: a single <=512-wide tile when the retained
    # spectrum is small, otherwise a multiple of 512 so the tile picker never
    # falls back to 128-wide blocks for awkward S.
    Mpad = _round_up(S, 128) if S <= 512 else _round_up(S, 512)
    vmem_limit = _vmem_limit_bytes()

    # TODO(synk): FFT / inverse FFT have no Pallas equivalent; they stay in XLA.
    x_ft = jnp.fft.rfftn(x, axes=(-2, -1))               # (B, Cin, H, Wf) complex64

    # Gather both retained frequency blocks once and flatten (block, n1, n2)
    # onto a single mode axis -> one pallas_call covers weights1 and weights2.
    a = jnp.stack([x_ft[:, :, :n1, :n2], x_ft[:, :, H - n1:, :n2]], axis=2)
    a = a.reshape(B, Cin, S)
    w = jnp.stack([weights1, weights2], axis=2).reshape(Cin, Cout, S)

    if min(Cin, Cout) >= _MXU_MIN_CHANNELS:
        o_re, o_im = _spectral_mix_mxu(a, w, Mpad, vmem_limit)
    else:
        o_re, o_im = _spectral_mix_vpu(a, w, Mpad, vmem_limit)

    o_c = lax.complex(o_re, o_im).reshape(B, Cout, 2, n1, n2)
    top, bot = o_c[:, :, 0], o_c[:, :, 1]

    # Assemble the output spectrum with pad + concatenate (one fused pass)
    # instead of two scatter .at[].set writes into a zeros array.
    if 2 * n1 <= H:
        colpad = ((0, 0), (0, 0), (0, 0), (0, Wf - n2))
        top = jnp.pad(top, colpad)
        bot = jnp.pad(bot, colpad)
        mid = jnp.zeros((B, Cout, H - 2 * n1, Wf), jnp.complex64)
        out_ft = jnp.concatenate([top, mid, bot], axis=2)
    else:
        # Overlapping mode rows (2*n1 > H): keep the reference's overwrite
        # semantics with explicit scatters.
        out_ft = jnp.zeros((B, Cout, H, Wf), dtype=jnp.complex64)
        out_ft = out_ft.at[:, :, :n1, :n2].set(top)
        out_ft = out_ft.at[:, :, H - n1:, :n2].set(bot)

    out = jnp.fft.irfftn(out_ft, s=(H, W), axes=(-2, -1))
    return out.astype(jnp.float32)


def _reference_forward(x, weights1, weights2, n_modes):
    """Pure-JAX reference mirroring the PyTorch module exactly."""
    n1, n2 = n_modes
    B, Cin, H, W = x.shape
    Cout = weights1.shape[1]
    Wf = W // 2 + 1
    x_ft = jnp.fft.rfftn(x, axes=(-2, -1))
    mul = functools.partial(jnp.einsum, 'bixy,ioxy->boxy',
                            precision=jax.lax.Precision.HIGHEST)
    out_ft = jnp.zeros((B, Cout, H, Wf), dtype=jnp.complex64)
    out_ft = out_ft.at[:, :, :n1, :n2].set(mul(x_ft[:, :, :n1, :n2], weights1))
    out_ft = out_ft.at[:, :, -n1:, :n2].set(mul(x_ft[:, :, -n1:, :n2], weights2))
    return jnp.fft.irfftn(out_ft, s=(H, W), axes=(-2, -1)).astype(jnp.float32)


def _make_params(key, cin, cout, n1, n2):
    scale = 1.0 / (cin * cout)
    k1r, k1i, k2r, k2i = jax.random.split(key, 4)
    w1 = (scale * jax.random.uniform(k1r, (cin, cout, n1, n2))
          + 1j * scale * jax.random.uniform(k1i, (cin, cout, n1, n2))).astype(jnp.complex64)
    w2 = (scale * jax.random.uniform(k2r, (cin, cout, n1, n2))
          + 1j * scale * jax.random.uniform(k2i, (cin, cout, n1, n2))).astype(jnp.complex64)
    return w1, w2


if __name__ == "__main__":
    fwd = jax.jit(spectral_conv2d, static_argnums=3)
    key = jax.random.PRNGKey(0)
    k_small, k_big = jax.random.split(key)

    # --- Small demo shapes (VPU path): batch=2, in=out=4 channels, 16x16 grid.
    B, Cin, Cout, H, W = 2, 4, 4, 16, 16
    n_modes = (6, 6)
    kx, kp = jax.random.split(k_small)
    x = jax.random.normal(kx, (B, Cin, H, W), dtype=jnp.float32)
    weights1, weights2 = _make_params(kp, Cin, Cout, *n_modes)

    out = jax.block_until_ready(fwd(x, weights1, weights2, n_modes))
    ref = jax.block_until_ready(_reference_forward(x, weights1, weights2, n_modes))
    assert out.shape == (B, Cout, H, W)
    assert jnp.allclose(out, ref, atol=1e-4, rtol=1e-4), "VPU-path mismatch vs reference"

    # --- Channel count large enough to exercise the MXU path (64 channels).
    #     (Looser tolerance: the in-kernel f32 matmul may use bf16 MXU passes.)
    B2, C2, H2, W2 = 2, 64, 16, 16
    n_modes2 = (4, 4)
    kx2, kp2 = jax.random.split(k_big)
    x2 = jax.random.normal(kx2, (B2, C2, H2, W2), dtype=jnp.float32)
    w1b, w2b = _make_params(kp2, C2, C2, *n_modes2)

    out2 = jax.block_until_ready(fwd(x2, w1b, w2b, n_modes2))
    ref2 = jax.block_until_ready(_reference_forward(x2, w1b, w2b, n_modes2))
    assert out2.shape == (B2, C2, H2, W2)
    assert jnp.allclose(out2, ref2, atol=1e-3, rtol=1e-3), "MXU-path mismatch vs reference"

    print("KERNEL_OK")
</pallas_src>

<mosaic_0001>
module attributes {stable_mosaic.version = 11 : i64} {
  func.func @_vpu_mix_kernel(%arg0: i32, %arg1: i32, %arg2: i32, %arg3: memref<4x2x128xf32, #tpu.memory_space<vmem>>, %arg4: memref<4x2x128xf32, #tpu.memory_space<vmem>>, %arg5: memref<4x4x128xf32, #tpu.memory_space<vmem>>, %arg6: memref<4x4x128xf32, #tpu.memory_space<vmem>>, %arg7: memref<2x4x128xf32, #tpu.memory_space<vmem>>, %arg8: memref<2x4x128xf32, #tpu.memory_space<vmem>>) attributes {dimension_semantics = [#tpu.dimension_semantics<parallel>, #tpu.dimension_semantics<parallel>, #tpu.dimension_semantics<arbitrary>], iteration_bounds = array<i64: 1, 1, 1>, scalar_prefetch = 0 : i64, scratch_operands = 0 : i64, tpu.core_type = #tpu.core_type<tc>, window_params = [{transform_indices = @transform_0, window_bounds = array<i64: 4, 2, 128>}, {transform_indices = @transform_1, window_bounds = array<i64: 4, 2, 128>}, {transform_indices = @transform_2, window_bounds = array<i64: 4, 4, 128>}, {transform_indices = @transform_3, window_bounds = array<i64: 4, 4, 128>}, {transform_indices = @transform_4, window_bounds = array<i64: 2, 4, 128>}, {transform_indices = @transform_5, window_bounds = array<i64: 2, 4, 128>}]} {
    %cst = arith.constant 0.000000e+00 : f32
    %0 = vector.broadcast %cst : f32 to vector<4x128xf32>
    %cst_0 = arith.constant 0.000000e+00 : f32
    %1 = vector.broadcast %cst_0 : f32 to vector<4x128xf32>
    %c0_i32 = arith.constant 0 : i32
    %2 = arith.index_cast %c0_i32 : i32 to index
    %c0 = arith.constant 0 : index
    %c0_1 = arith.constant 0 : index
    %3 = vector.load %arg3[%2, %c0, %c0_1] : memref<4x2x128xf32, #tpu.memory_space<vmem>>, vector<1x1x128xf32>
    %4 = vector.shape_cast %3 : vector<1x1x128xf32> to vector<1x128xf32>
    %5 = arith.index_cast %c0_i32 : i32 to index
    %c0_2 = arith.constant 0 : index
    %c0_3 = arith.constant 0 : index
    %6 = vector.load %arg4[%5, %c0_2, %c0_3] : memref<4x2x128xf32, #tpu.memory_space<vmem>>, vector<1x1x128xf32>
    %7 = vector.shape_cast %6 : vector<1x1x128xf32> to vector<1x128xf32>
    %8 = arith.index_cast %c0_i32 : i32 to index
    %c0_4 = arith.constant 0 : index
    %c0_5 = arith.constant 0 : index
    %9 = vector.load %arg5[%8, %c0_4, %c0_5] : memref<4x4x128xf32, #tpu.memory_space<vmem>>, vector<1x4x128xf32>
    %10 = vector.shape_cast %9 : vector<1x4x128xf32> to vector<4x128xf32>
    %11 = arith.index_cast %c0_i32 : i32 to index
    %c0_6 = arith.constant 0 : index
    %c0_7 = arith.constant 0 : index
    %12 = vector.load %arg6[%11, %c0_6, %c0_7] : memref<4x4x128xf32, #tpu.memory_space<vmem>>, vector<1x4x128xf32>
    %13 = vector.shape_cast %12 : vector<1x4x128xf32> to vector<4x128xf32>
    %14 = vector.broadcast %4 : vector<1x128xf32> to vector<4x128xf32>
    %15 = arith.mulf %14, %10 : vector<4x128xf32>
    %16 = vector.broadcast %7 : vector<1x128xf32> to vector<4x128xf32>
    %17 = arith.mulf %16, %13 : vector<4x128xf32>
    %18 = arith.subf %15, %17 : vector<4x128xf32>
    %19 = arith.addf %0, %18 : vector<4x128xf32>
    %20 = vector.broadcast %4 : vector<1x128xf32> to vector<4x128xf32>
    %21 = arith.mulf %20, %13 : vector<4x128xf32>
    %22 = vector.broadcast %7 : vector<1x128xf32> to vector<4x128xf32>
    %23 = arith.mulf %22, %10 : vector<4x128xf32>
    %24 = arith.addf %21, %23 : vector<4x128xf32>
    %25 = arith.addf %1, %24 : vector<4x128xf32>
    %c1_i32 = arith.constant 1 : i32
    %26 = arith.index_cast %c1_i32 : i32 to index
    %c0_8 = arith.constant 0 : index
    %c0_9 = arith.constant 0 : index
    %27 = vector.load %arg3[%26, %c0_8, %c0_9] : memref<4x2x128xf32, #tpu.memory_space<vmem>>, vector<1x1x128xf32>
    %28 = vector.shape_cast %27 : vector<1x1x128xf32> to vector<1x128xf32>
    %29 = arith.index_cast %c1_i32 : i32 to index
    %c0_10 = arith.constant 0 : index
    %c0_11 = arith.constant 0 : index
    %30 = vector.load %arg4[%29, %c0_10, %c0_11] : memref<4x2x128xf32, #tpu.memory_space<vmem>>, vector<1x1x128xf32>
    %31 = vector.shape_cast %30 : vector<1x1x128xf32> to vector<1x128xf32>
    %32 = arith.index_cast %c1_i32 : i32 to index
    %c0_12 = arith.constant 0 : index
    %c0_13 = arith.constant 0 : index
    %33 = vector.load %arg5[%32, %c0_12, %c0_13] : memref<4x4x128xf32, #tpu.memory_space<vmem>>, vector<1x4x128xf32>
    %34 = vector.shape_cast %33 : vector<1x4x128xf32> to vector<4x128xf32>
    %35 = arith.index_cast %c1_i32 : i32 to index
    %c0_14 = arith.constant 0 : index
    %c0_15 = arith.constant 0 : index
    %36 = vector.load %arg6[%35, %c0_14, %c0_15] : memref<4x4x128xf32, #tpu.memory_space<vmem>>, vector<1x4x128xf32>
    %37 = vector.shape_cast %36 : vector<1x4x128xf32> to vector<4x128xf32>
    %38 = vector.broadcast %28 : vector<1x128xf32> to vector<4x128xf32>
    %39 = arith.mulf %38, %34 : vector<4x128xf32>
    %40 = vector.broadcast %31 : vector<1x128xf32> to vector<4x128xf32>
    %41 = arith.mulf %40, %37 : vector<4x128xf32>
    %42 = arith.subf %39, %41 : vector<4x128xf32>
    %43 = arith.addf %19, %42 : vector<4x128xf32>
    %44 = vector.broadcast %28 : vector<1x128xf32> to vector<4x128xf32>
    %45 = arith.mulf %44, %37 : vector<4x128xf32>
    %46 = vector.broadcast %31 : vector<1x128xf32> to vector<4x128xf32>
    %47 = arith.mulf %46, %34 : vector<4x128xf32>
    %48 = arith.addf %45, %47 : vector<4x128xf32>
    %49 = arith.addf %25, %48 : vector<4x128xf32>
    %c2_i32 = arith.constant 2 : i32
    %50 = arith.index_cast %c2_i32 : i32 to index
    %c0_16 = arith.constant 0 : index
    %c0_17 = arith.constant 0 : index
    %51 = vector.load %arg3[%50, %c0_16, %c0_17] : memref<4x2x128xf32, #tpu.memory_space<vmem>>, vector<1x1x128xf32>
    %52 = vector.shape_cast %51 : vector<1x1x128xf32> to vector<1x128xf32>
    %53 = arith.index_cast %c2_i32 : i32 to index
    %c0_18 = arith.constant 0 : index
    %c0_19 = arith.constant 0 : index
    %54 = vector.load %arg4[%53, %c0_18, %c0_19] : memref<4x2x128xf32, #tpu.memory_space<vmem>>, vector<1x1x128xf32>
    %55 = vector.shape_cast %54 : vector<1x1x128xf32> to vector<1x128xf32>
    %56 = arith.index_cast %c2_i32 : i32 to index
    %c0_20 = arith.constant 0 : index
    %c0_21 = arith.constant 0 : index
    %57 = vector.load %arg5[%56, %c0_20, %c0_21] : memref<4x4x128xf32, #tpu.memory_space<vmem>>, vector<1x4x128xf32>
    %58 = vector.shape_cast %57 : vector<1x4x128xf32> to vector<4x128xf32>
    %59 = arith.index_cast %c2_i32 : i32 to index
    %c0_22 = arith.constant 0 : index
    %c0_23 = arith.constant 0 : index
    %60 = vector.load %arg6[%59, %c0_22, %c0_23] : memref<4x4x128xf32, #tpu.memory_space<vmem>>, vector<1x4x128xf32>
    %61 = vector.shape_cast %60 : vector<1x4x128xf32> to vector<4x128xf32>
    %62 = vector.broadcast %52 : vector<1x128xf32> to vector<4x128xf32>
    %63 = arith.mulf %62, %58 : vector<4x128xf32>
    %64 = vector.broadcast %55 : vector<1x128xf32> to vector<4x128xf32>
    %65 = arith.mulf %64, %61 : vector<4x128xf32>
    %66 = arith.subf %63, %65 : vector<4x128xf32>
    %67 = arith.addf %43, %66 : vector<4x128xf32>
    %68 = vector.broadcast %52 : vector<1x128xf32> to vector<4x128xf32>
    %69 = arith.mulf %68, %61 : vector<4x128xf32>
    %70 = vector.broadcast %55 : vector<1x128xf32> to vector<4x128xf32>
    %71 = arith.mulf %70, %58 : vector<4x128xf32>
    %72 = arith.addf %69, %71 : vector<4x128xf32>
    %73 = arith.addf %49, %72 : vector<4x128xf32>
    %c3_i32 = arith.constant 3 : i32
    %74 = arith.index_cast %c3_i32 : i32 to index
    %c0_24 = arith.constant 0 : index
    %c0_25 = arith.constant 0 : index
    %75 = vector.load %arg3[%74, %c0_24, %c0_25] : memref<4x2x128xf32, #tpu.memory_space<vmem>>, vector<1x1x128xf32>
    %76 = vector.shape_cast %75 : vector<1x1x128xf32> to vector<1x128xf32>
    %77 = arith.index_cast %c3_i32 : i32 to index
    %c0_26 = arith.constant 0 : index
    %c0_27 = arith.constant 0 : index
    %78 = vector.load %arg4[%77, %c0_26, %c0_27] : memref<4x2x128xf32, #tpu.memory_space<vmem>>, vector<1x1x128xf32>
    %79 = vector.shape_cast %78 : vector<1x1x128xf32> to vector<1x128xf32>
    %80 = arith.index_cast %c3_i32 : i32 to index
    %c0_28 = arith.constant 0 : index
    %c0_29 = arith.constant 0 : index
    %81 = vector.load %arg5[%80, %c0_28, %c0_29] : memref<4x4x128xf32, #tpu.memory_space<vmem>>, vector<1x4x128xf32>
    %82 = vector.shape_cast %81 : vector<1x4x128xf32> to vector<4x128xf32>
    %83 = arith.index_cast %c3_i32 : i32 to index
    %c0_30 = arith.constant 0 : index
    %c0_31 = arith.constant 0 : index
    %84 = vector.load %arg6[%83, %c0_30, %c0_31] : memref<4x4x128xf32, #tpu.memory_space<vmem>>, vector<1x4x128xf32>
    %85 = vector.shape_cast %84 : vector<1x4x128xf32> to vector<4x128xf32>
    %86 = vector.broadcast %76 : vector<1x128xf32> to vector<4x128xf32>
    %87 = arith.mulf %86, %82 : vector<4x128xf32>
    %88 = vector.broadcast %79 : vector<1x128xf32> to vector<4x128xf32>
    %89 = arith.mulf %88, %85 : vector<4x128xf32>
    %90 = arith.subf %87, %89 : vector<4x128xf32>
    %91 = arith.addf %67, %90 : vector<4x128xf32>
    %92 = vector.broadcast %76 : vector<1x128xf32> to vector<4x128xf32>
    %93 = arith.mulf %92, %85 : vector<4x128xf32>
    %94 = vector.broadcast %79 : vector<1x128xf32> to vector<4x128xf32>
    %95 = arith.mulf %94, %82 : vector<4x128xf32>
    %96 = arith.addf %93, %95 : vector<4x128xf32>
    %97 = arith.addf %73, %96 : vector<4x128xf32>
    %c4_i32 = arith.constant 4 : i32
    %c0_32 = arith.constant 0 : index
    %c0_33 = arith.constant 0 : index
    %c0_34 = arith.constant 0 : index
    %98 = vector.load %arg7[%c0_32, %c0_33, %c0_34] : memref<2x4x128xf32, #tpu.memory_space<vmem>>, vector<1x4x128xf32>
    %99 = vector.shape_cast %98 : vector<1x4x128xf32> to vector<4x128xf32>
    %100 = vector.shape_cast %91 : vector<4x128xf32> to vector<1x4x128xf32>
    tpu.vector_store %arg7[%c0_32, %c0_33, %c0_34], %100 {strides = array<i32>} : memref<2x4x128xf32, #tpu.memory_space<vmem>>, vector<1x4x128xf32>,
    %c0_35 = arith.constant 0 : index
    %c0_36 = arith.constant 0 : index
    %c0_37 = arith.constant 0 : index
    %101 = vector.load %arg8[%c0_35, %c0_36, %c0_37] : memref<2x4x128xf32, #tpu.memory_space<vmem>>, vector<1x4x128xf32>
    %102 = vector.shape_cast %101 : vector<1x4x128xf32> to vector<4x128xf32>
    %103 = vector.shape_cast %97 : vector<4x128xf32> to vector<1x4x128xf32>
    tpu.vector_store %arg8[%c0_35, %c0_36, %c0_37], %103 {strides = array<i32>} : memref<2x4x128xf32, #tpu.memory_space<vmem>>, vector<1x4x128xf32>,
    %cst_38 = arith.constant 0.000000e+00 : f32
    %104 = vector.broadcast %cst_38 : f32 to vector<4x128xf32>
    %cst_39 = arith.constant 0.000000e+00 : f32
    %105 = vector.broadcast %cst_39 : f32 to vector<4x128xf32>
    %c0_i32_40 = arith.constant 0 : i32
    %106 = arith.index_cast %c0_i32_40 : i32 to index
    %c1 = arith.constant 1 : index
    %c0_41 = arith.constant 0 : index
    %107 = vector.load %arg3[%106, %c1, %c0_41] : memref<4x2x128xf32, #tpu.memory_space<vmem>>, vector<1x1x128xf32>
    %108 = vector.shape_cast %107 : vector<1x1x128xf32> to vector<1x128xf32>
    %109 = arith.index_cast %c0_i32_40 : i32 to index
    %c1_42 = arith.constant 1 : index
    %c0_43 = arith.constant 0 : index
    %110 = vector.load %arg4[%109, %c1_42, %c0_43] : memref<4x2x128xf32, #tpu.memory_space<vmem>>, vector<1x1x128xf32>
    %111 = vector.shape_cast %110 : vector<1x1x128xf32> to vector<1x128xf32>
    %112 = arith.index_cast %c0_i32_40 : i32 to index
    %c0_44 = arith.constant 0 : index
    %c0_45 = arith.constant 0 : index
    %113 = vector.load %arg5[%112, %c0_44, %c0_45] : memref<4x4x128xf32, #tpu.memory_space<vmem>>, vector<1x4x128xf32>
    %114 = vector.shape_cast %113 : vector<1x4x128xf32> to vector<4x128xf32>
    %115 = arith.index_cast %c0_i32_40 : i32 to index
    %c0_46 = arith.constant 0 : index
    %c0_47 = arith.constant 0 : index
    %116 = vector.load %arg6[%115, %c0_46, %c0_47] : memref<4x4x128xf32, #tpu.memory_space<vmem>>, vector<1x4x128xf32>
    %117 = vector.shape_cast %116 : vector<1x4x128xf32> to vector<4x128xf32>
    %118 = vector.broadcast %108 : vector<1x128xf32> to vector<4x128xf32>
    %119 = arith.mulf %118, %114 : vector<4x128xf32>
    %120 = vector.broadcast %111 : vector<1x128xf32> to vector<4x128xf32>
    %121 = arith.mulf %120, %117 : vector<4x128xf32>
    %122 = arith.subf %119, %121 : vector<4x128xf32>
    %123 = arith.addf %104, %122 : vector<4x128xf32>
    %124 = vector.broadcast %108 : vector<1x128xf32> to vector<4x128xf32>
    %125 = arith.mulf %124, %117 : vector<4x128xf32>
    %126 = vector.broadcast %111 : vector<1x128xf32> to vector<4x128xf32>
    %127 = arith.mulf %126, %114 : vector<4x128xf32>
    %128 = arith.addf %125, %127 : vector<4x128xf32>
    %129 = arith.addf %105, %128 : vector<4x128xf32>
    %c1_i32_48 = arith.constant 1 : i32
    %130 = arith.index_cast %c1_i32_48 : i32 to index
    %c1_49 = arith.constant 1 : index
    %c0_50 = arith.constant 0 : index
    %131 = vector.load %arg3[%130, %c1_49, %c0_50] : memref<4x2x128xf32, #tpu.memory_space<vmem>>, vector<1x1x128xf32>
    %132 = vector.shape_cast %131 : vector<1x1x128xf32> to vector<1x128xf32>
    %133 = arith.index_cast %c1_i32_48 : i32 to index
    %c1_51 = arith.constant 1 : index
    %c0_52 = arith.constant 0 : index
    %134 = vector.load %arg4[%133, %c1_51, %c0_52] : memref<4x2x128xf32, #tpu.memory_space<vmem>>, vector<1x1x128xf32>
    %135 = vector.shape_cast %134 : vector<1x1x128xf32> to vector<1x128xf32>
    %136 = arith.index_cast %c1_i32_48 : i32 to index
    %c0_53 = arith.constant 0 : index
    %c0_54 = arith.constant 0 : index
    %137 = vector.load %arg5[%136, %c0_53, %c0_54] : memref<4x4x128xf32, #tpu.memory_space<vmem>>, vector<1x4x128xf32>
    %138 = vector.shape_cast %137 : vector<1x4x128xf32> to vector<4x128xf32>
    %139 = arith.index_cast %c1_i32_48 : i32 to index
    %c0_55 = arith.constant 0 : index
    %c0_56 = arith.constant 0 : index
    %140 = vector.load %arg6[%139, %c0_55, %c0_56] : memref<4x4x128xf32, #tpu.memory_space<vmem>>, vector<1x4x128xf32>
    %141 = vector.shape_cast %140 : vector<1x4x128xf32> to vector<4x128xf32>
    %142 = vector.broadcast %132 : vector<1x128xf32> to vector<4x128xf32>
    %143 = arith.mulf %142, %138 : vector<4x128xf32>
    %144 = vector.broadcast %135 : vector<1x128xf32> to vector<4x128xf32>
    %145 = arith.mulf %144, %141 : vector<4x128xf32>
    %146 = arith.subf %143, %145 : vector<4x128xf32>
    %147 = arith.addf %123, %146 : vector<4x128xf32>
    %148 = vector.broadcast %132 : vector<1x128xf32> to vector<4x128xf32>
    %149 = arith.mulf %148, %141 : vector<4x128xf32>
    %150 = vector.broadcast %135 : vector<1x128xf32> to vector<4x128xf32>
    %151 = arith.mulf %150, %138 : vector<4x128xf32>
    %152 = arith.addf %149, %151 : vector<4x128xf32>
    %153 = arith.addf %129, %152 : vector<4x128xf32>
    %c2_i32_57 = arith.constant 2 : i32
    %154 = arith.index_cast %c2_i32_57 : i32 to index
    %c1_58 = arith.constant 1 : index
    %c0_59 = arith.constant 0 : index
    %155 = vector.load %arg3[%154, %c1_58, %c0_59] : memref<4x2x128xf32, #tpu.memory_space<vmem>>, vector<1x1x128xf32>
    %156 = vector.shape_cast %155 : vector<1x1x128xf32> to vector<1x128xf32>
    %157 = arith.index_cast %c2_i32_57 : i32 to index
    %c1_60 = arith.constant 1 : index
    %c0_61 = arith.constant 0 : index
    %158 = vector.load %arg4[%157, %c1_60, %c0_61] : memref<4x2x128xf32, #tpu.memory_space<vmem>>, vector<1x1x128xf32>
    %159 = vector.shape_cast %158 : vector<1x1x128xf32> to vector<1x128xf32>
    %160 = arith.index_cast %c2_i32_57 : i32 to index
    %c0_62 = arith.constant 0 : index
    %c0_63 = arith.constant 0 : index
    %161 = vector.load %arg5[%160, %c0_62, %c0_63] : memref<4x4x128xf32, #tpu.memory_space<vmem>>, vector<1x4x128xf32>
    %162 = vector.shape_cast %161 : vector<1x4x128xf32> to vector<4x128xf32>
    %163 = arith.index_cast %c2_i32_57 : i32 to index
    %c0_64 = arith.constant 0 : index
    %c0_65 = arith.constant 0 : index
    %164 = vector.load %arg6[%163, %c0_64, %c0_65] : memref<4x4x128xf32, #tpu.memory_space<vmem>>, vector<1x4x128xf32>
    %165 = vector.shape_cast %164 : vector<1x4x128xf32> to vector<4x128xf32>
    %166 = vector.broadcast %156 : vector<1x128xf32> to vector<4x128xf32>
    %167 = arith.mulf %166, %162 : vector<4x128xf32>
    %168 = vector.broadcast %159 : vector<1x128xf32> to vector<4x128xf32>
    %169 = arith.mulf %168, %165 : vector<4x128xf32>
    %170 = arith.subf %167, %169 : vector<4x128xf32>
    %171 = arith.addf %147, %170 : vector<4x128xf32>
    %172 = vector.broadcast %156 : vector<1x128xf32> to vector<4x128xf32>
    %173 = arith.mulf %172, %165 : vector<4x128xf32>
    %174 = vector.broadcast %159 : vector<1x128xf32> to vector<4x128xf32>
    %175 = arith.mulf %174, %162 : vector<4x128xf32>
    %176 = arith.addf %173, %175 : vector<4x128xf32>
    %177 = arith.addf %153, %176 : vector<4x128xf32>
    %c3_i32_66 = arith.constant 3 : i32
    %178 = arith.index_cast %c3_i32_66 : i32 to index
    %c1_67 = arith.constant 1 : index
    %c0_68 = arith.constant 0 : index
    %179 = vector.load %arg3[%178, %c1_67, %c0_68] : memref<4x2x128xf32, #tpu.memory_space<vmem>>, vector<1x1x128xf32>
    %180 = vector.shape_cast %179 : vector<1x1x128xf32> to vector<1x128xf32>
    %181 = arith.index_cast %c3_i32_66 : i32 to index
    %c1_69 = arith.constant 1 : index
    %c0_70 = arith.constant 0 : index
    %182 = vector.load %arg4[%181, %c1_69, %c0_70] : memref<4x2x128xf32, #tpu.memory_space<vmem>>, vector<1x1x128xf32>
    %183 = vector.shape_cast %182 : vector<1x1x128xf32> to vector<1x128xf32>
    %184 = arith.index_cast %c3_i32_66 : i32 to index
    %c0_71 = arith.constant 0 : index
    %c0_72 = arith.constant 0 : index
    %185 = vector.load %arg5[%184, %c0_71, %c0_72] : memref<4x4x128xf32, #tpu.memory_space<vmem>>, vector<1x4x128xf32>
    %186 = vector.shape_cast %185 : vector<1x4x128xf32> to vector<4x128xf32>
    %187 = arith.index_cast %c3_i32_66 : i32 to index
    %c0_73 = arith.constant 0 : index
    %c0_74 = arith.constant 0 : index
    %188 = vector.load %arg6[%187, %c0_73, %c0_74] : memref<4x4x128xf32, #tpu.memory_space<vmem>>, vector<1x4x128xf32>
    %189 = vector.shape_cast %188 : vector<1x4x128xf32> to vector<4x128xf32>
    %190 = vector.broadcast %180 : vector<1x128xf32> to vector<4x128xf32>
    %191 = arith.mulf %190, %186 : vector<4x128xf32>
    %192 = vector.broadcast %183 : vector<1x128xf32> to vector<4x128xf32>
    %193 = arith.mulf %192, %189 : vector<4x128xf32>
    %194 = arith.subf %191, %193 : vector<4x128xf32>
    %195 = arith.addf %171, %194 : vector<4x128xf32>
    %196 = vector.broadcast %180 : vector<1x128xf32> to vector<4x128xf32>
    %197 = arith.mulf %196, %189 : vector<4x128xf32>
    %198 = vector.broadcast %183 : vector<1x128xf32> to vector<4x128xf32>
    %199 = arith.mulf %198, %186 : vector<4x128xf32>
    %200 = arith.addf %197, %199 : vector<4x128xf32>
    %201 = arith.addf %177, %200 : vector<4x128xf32>
    %c4_i32_75 = arith.constant 4 : i32
    %c1_76 = arith.constant 1 : index
    %c0_77 = arith.constant 0 : index
    %c0_78 = arith.constant 0 : index
    %202 = vector.load %arg7[%c1_76, %c0_77, %c0_78] : memref<2x4x128xf32, #tpu.memory_space<vmem>>, vector<1x4x128xf32>
    %203 = vector.shape_cast %202 : vector<1x4x128xf32> to vector<4x128xf32>
    %204 = vector.shape_cast %195 : vector<4x128xf32> to vector<1x4x128xf32>
    tpu.vector_store %arg7[%c1_76, %c0_77, %c0_78], %204 {strides = array<i32>} : memref<2x4x128xf32, #tpu.memory_space<vmem>>, vector<1x4x128xf32>,
    %c1_79 = arith.constant 1 : index
    %c0_80 = arith.constant 0 : index
    %c0_81 = arith.constant 0 : index
    %205 = vector.load %arg8[%c1_79, %c0_80, %c0_81] : memref<2x4x128xf32, #tpu.memory_space<vmem>>, vector<1x4x128xf32>
    %206 = vector.shape_cast %205 : vector<1x4x128xf32> to vector<4x128xf32>
    %207 = vector.shape_cast %201 : vector<4x128xf32> to vector<1x4x128xf32>
    tpu.vector_store %arg8[%c1_79, %c0_80, %c0_81], %207 {strides = array<i32>} : memref<2x4x128xf32, #tpu.memory_space<vmem>>, vector<1x4x128xf32>,
    return
  }
  func.func @transform_0(%arg0: i32, %arg1: i32, %arg2: i32) -> (i32, i32, i32) {
    %c0_i32 = arith.constant 0 : i32
    %c0_i32_0 = arith.constant 0 : i32
    return %c0_i32, %arg2, %arg1 : i32, i32, i32
  }
  func.func @transform_1(%arg0: i32, %arg1: i32, %arg2: i32) -> (i32, i32, i32) {
    %c0_i32 = arith.constant 0 : i32
    %c0_i32_0 = arith.constant 0 : i32
    return %c0_i32, %arg2, %arg1 : i32, i32, i32
  }
  func.func @transform_2(%arg0: i32, %arg1: i32, %arg2: i32) -> (i32, i32, i32) {
    %c0_i32 = arith.constant 0 : i32
    %c0_i32_0 = arith.constant 0 : i32
    return %c0_i32, %arg0, %arg1 : i32, i32, i32
  }
  func.func @transform_3(%arg0: i32, %arg1: i32, %arg2: i32) -> (i32, i32, i32) {
    %c0_i32 = arith.constant 0 : i32
    %c0_i32_0 = arith.constant 0 : i32
    return %c0_i32, %arg0, %arg1 : i32, i32, i32
  }
  func.func @transform_4(%arg0: i32, %arg1: i32, %arg2: i32) -> (i32, i32, i32) {
    %c0_i32 = arith.constant 0 : i32
    return %arg2, %arg0, %arg1 : i32, i32, i32
  }
  func.func @transform_5(%arg0: i32, %arg1: i32, %arg2: i32) -> (i32, i32, i32) {
    %c0_i32 = arith.constant 0 : i32
    return %arg2, %arg0, %arg1 : i32, i32, i32
  }
}

</mosaic_0001>

<bundles_post_ra>
// kernel: custom-call
= control target key start
LH: loop header
LB: loop body
LE: loop exit
PB: predicated region body
PF: predicated region fallthrough
CT: control target
= control target key end

     0   :  { %2 = vsyncpa [#allocation0], 0  ;;  %s61_s0 = inlined_call_operand.hbm [shape: c64[4,4,6,6], index: 0, kind: input, shape index: {}]   ;;  %s62_s1 = inlined_call_operand.vmem [shape: f32[4,4,6,6], index: 1, kind: output, shape index: {}]  }
   0x1   :  { %s3_s8 = sshll.u32 %s62_s1, 4  ;;  %s9_s11 = scalar_lea.hbm %s61_s0, 1536  ;;  %s4_s8 = int_to_ptr.vmem [resolvable:$true] %s3_s8 }
   0x2   :  { %p10_p0 = scmp.ne.s32.totalorder %s61_s0, %s9_s11  ;;  %s11_s16 = scalar_lea.hbm %s61_s0, 3072 }
   0x3   :  { %p12_p1 = scmp.lt.u32.totalorder %s11_s16, %s9_s11  ;;  %p13_p2 = scmp.lt.u32.totalorder %s9_s11, %s61_s0 }
   0x5   :  { %p14_p3 = por %p13_p2, %p12_p1 }
   0x7   :  { %p15_p4 = pnand %p14_p3, %p10_p0 }
   0x9   :  { %18 = shalt.err (!%p15_p4)  }
   0xa   :  { %s19_s1 = scalar_lea.vmem %s4_s8, 1536  ;;  %p24_p6 = scmp.lt.s32.totalorder %s4_s8, %s4_s8 }
   0xb   :  { %p20_p5 = scmp.ne.s32.totalorder %s4_s8, %s19_s1  ;;  %p25_p7 = scmp.lt.s32.totalorder %s19_s1, %s19_s1 }
   0xd   :  { %p26_p8 = por %p25_p7, %p24_p6 }
   0xf   :  { %p27_p9 = pnand %p26_p8, %p20_p5 }
  0x11   :  { %30 = shalt.err (!%p27_p9)  }
  0x12   :  { %6 = dma.hbm_to_vmem [thread:$0]  %s61_s0, 1536, %s4_s8, [#allocation0] }
  0x13   :  { %31 = dma.done.wait [#allocation0], 1536  }
  0x14   :  { %32 = vsyncadd [#allocation0], 4294965760 }
  0x15   :  { %8 = vsyncpa [#allocation0], 1 }

// kernel: custom-call.1
= control target key start
LH: loop header
LB: loop body
LE: loop exit
PB: predicated region body
PF: predicated region fallthrough
CT: control target
= control target key end

     0   :  { %s59_s0 = inlined_call_operand.hbm [shape: c64[4,4,6,6], index: 0, kind: input, shape index: {}]   ;;  %s60_s1 = inlined_call_operand.vmem [shape: f32[4,4,6,6], index: 1, kind: output, shape index: {}]  }
   0x1   :  { %s2_s8 = scalar_lea.hbm %s59_s0, 1536 }
   0x2   :  { %3 = vsyncpa [#allocation0], 0  ;;  %s4_s11 = sshll.u32 %s60_s1, 4  ;;  %s34_s14 = scalar_lea.hbm %s59_s0, 3072  ;;  %s5_s11 = int_to_ptr.vmem [resolvable:$true] %s4_s11 }
   0x3   :  { %p11_p0 = scmp.ne.s32.totalorder %s2_s8, %s34_s14  ;;  %p13_p1 = scmp.lt.u32.totalorder %s2_s8, %s59_s0 }
   0x4   :  { %p14_p2 = scmp.lt.u32.totalorder %s34_s14, %s34_s14  ;;  %p16_p4 = scmp.lt.u32.totalorder %s34_s14, %s2_s8 }
   0x6   :  { %p15_p3 = por %p14_p2, %p13_p1 }
   0x8   :  { %p17_p5 = por %p16_p4, %p15_p3 }
   0xa   :  { %p18_p6 = pnand %p17_p5, %p11_p0 }
   0xc   :  { %21 = shalt.err (!%p18_p6)  }
   0xd   :  { %s22_s17 = scalar_lea.vmem %s5_s11, 1536  ;;  %p27_p8 = scmp.lt.s32.totalorder %s5_s11, %s5_s11 }
   0xe   :  { %p23_p7 = scmp.ne.s32.totalorder %s5_s11, %s22_s17  ;;  %p28_p9 = scmp.lt.s32.totalorder %s22_s17, %s22_s17 }
  0x10   :  { %p29_p10 = por %p28_p9, %p27_p8 }
  0x12   :  { %p30_p11 = pnand %p29_p10, %p23_p7 }
  0x14   :  { %33 = shalt.err (!%p30_p11)  }
  0x15   :  { %7 = dma.hbm_to_vmem [thread:$0]  %s2_s8, 1536, %s5_s11, [#allocation0] }
  0x16   :  { %35 = dma.done.wait [#allocation0], 1536  }
  0x17   :  { %36 = vsyncadd [#allocation0], 4294965760 }
  0x18   :  { %9 = vsyncpa [#allocation0], 1 }

// kernel: reverse.0
= control target key start
LH: loop header
LB: loop body
LE: loop exit
PB: predicated region body
PF: predicated region fallthrough
CT: control target
= control target key end

     0   :  { %v71_v3 = vlaneseq  ;;  %v64_v9 = vld [vmem:[#allocation0 + $0x7] ss:$-1 sm:$0xff]  ;;  %v78_v12 = vld [vmem:[#allocation0 + $0x17] ss:$-1 sm:$0xff]  ;;  %s329_s0 = inlined_call_operand.vmem [shape: f32[2,4,16,7], index: 0, kind: input, shape index: {}]   ;;  %s330_s1 = inlined_call_operand.vmem [shape: f32[2,4,16,7], index: 1, kind: output, shape index: {}]  }
   0x1   :  { %v44_v0 = vld [vmem:[%s329_s0] sm:$0xff]  ;;  %v46_v1 = vld [vmem:[%s329_s0 + $0x8] sm:$0xff]  ;;  %v48_v2 = vld [vmem:[%s329_s0 + $0x10] sm:$0xff]  ;;  %v65_v10 = vrot.slane %v64_v9, 1  ;;  %v79_v14 = vrot.slane %v78_v12, 1 }
   0x2   :  { %45 = vst [vmem:[#allocation0 + $0x8] sm:$0xff] %v44_v0  ;;  %47 = vst [vmem:[#allocation0 + $0x18] sm:$0xff] %v46_v1  ;;  %v50_v4 = vld [vmem:[%s329_s0 + $0x18] sm:$0xff]  ;;  %v52_v5 = vld [vmem:[%s329_s0 + $0x20] sm:$0xff]  ;;  %v72_v11 = vshrl.u32 %v71_v3, 7 }
   0x3   :  { %49 = vst [vmem:[#allocation0 + $0x28] sm:$0xff] %v48_v2  ;;  %v54_v6 = vld [vmem:[%s329_s0 + $0x28] sm:$0xff]  ;;  %51 = vst [vmem:[#allocation0 + $0x38] sm:$0xff] %v50_v4  ;;  %v56_v7 = vld [vmem:[%s329_s0 + $0x30] sm:$0xff] }
   0x4   :  { %53 = vst [vmem:[#allocation0 + $0x48] sm:$0xff] %v52_v5  ;;  %55 = vst [vmem:[#allocation0 + $0x58] sm:$0xff] %v54_v6  ;;  %v58_v8 = vld [vmem:[%s329_s0 + $0x38] sm:$0xff]  ;;  %v92_v13 = vld [vmem:[#allocation0 + $0x27] ss:$-1 sm:$0xff]  ;;  %vm73_vm0 = vcmp.lt.s32.totalorder %v72_v11, 7 }
   0x5   :  { %57 = vst [vmem:[#allocation0 + $0x68] sm:$0xff] %v56_v7  ;;  %59 = vst [vmem:[#allocation0 + $0x78] sm:$0xff] %v58_v8  ;;  %v93_v15 = vrot.slane %v92_v13, 1  ;;  %v106_v16 = vld [vmem:[#allocation0 + $0x37] ss:$-1 sm:$0xff] }
   0x6   :  { %66 = vst [vmem:[#allocation1] sm:$0xff] %v65_v10  ;;  %v107_v17 = vrot.slane %v106_v16, 1  ;;  %v120_v18 = vld [vmem:[#allocation0 + $0x47] ss:$-1 sm:$0xff]  ;;  %v134_v19 = vld [vmem:[#allocation0 + $0x57] ss:$-1 sm:$0xff] }
   0x7   :  { %80 = vst [vmem:[#allocation1 + $0x8] sm:$0xff] %v79_v14  ;;  %94 = vst [vmem:[#allocation1 + $0x10] sm:$0xff] %v93_v15  ;;  %v121_v20 = vrot.slane %v120_v18, 1  ;;  %v135_v21 = vrot.slane %v134_v19, 1  ;;  %v148_v22 = vld [vmem:[#allocation0 + $0x67] ss:$-1 sm:$0xff] }
   0x8   :  { %v162_v23 = vld [vmem:[#allocation0 + $0x77] ss:$-1 sm:$0xff]  ;;  %108 = vst [vmem:[#allocation1 + $0x18] sm:$0xff] %v107_v17  ;;  %v149_v24 = vrot.slane %v148_v22, 1 }
   0x9   :  { %v163_v25 = vrot.slane %v162_v23, 1  ;;  %v69_v26 = vld [vmem:[#allocation0 + $0xf] ss:$-1 sm:$0xff]  ;;  %v83_v27 = vld [vmem:[#allocation0 + $0x1f] ss:$-1 sm:$0xff]  ;;  %122 = vst [vmem:[#allocation1 + $0x20] sm:$0xff] %v121_v20 }
   0xa   :  { %v97_v28 = vld [vmem:[#allocation0 + $0x2f] ss:$-1 sm:$0xff]  ;;  %136 = vst [vmem:[#allocation1 + $0x28] sm:$0xff] %v135_v21  ;;  %v70_v29 = vrot.slane %v69_v26, 1  ;;  %v84_v30 = vrot.slane %v83_v27, 1  ;;  %150 = vst [vmem:[#allocation1 + $0x30] sm:$0xff] %v149_v24 }
   0xb   :  { %v98_v31 = vrot.slane %v97_v28, 1  ;;  %v111_v32 = vld [vmem:[#allocation0 + $0x3f] ss:$-1 sm:$0xff]  ;;  %164 = vst [vmem:[#allocation1 + $0x38] sm:$0xff] %v163_v25  ;;  %v125_v34 = vld [vmem:[#allocation0 + $0x4f] ss:$-1 sm:$0xff] }
   0xc   :  { %v112_v33 = vrot.slane %v111_v32, 1  ;;  %v139_v35 = vld [vmem:[#allocation0 + $0x5f] ss:$-1 sm:$0xff]  ;;  %74 = vst.msk [vmem:[#allocation1] sm:$0xff] %vm73_vm0, %v70_v29  ;;  %88 = vst.msk [vmem:[#allocation1 + $0x8] sm:$0xff] %vm73_vm0, %v84_v30  ;;  %v126_v36 = vrot.slane %v125_v34, 1 }
   0xd   :  { %102 = vst.msk [vmem:[#allocation1 + $0x10] sm:$0xff] %vm73_vm0, %v98_v31  ;;  %v140_v37 = vrot.slane %v139_v35, 1  ;;  %v153_v38 = vld [vmem:[#allocation0 + $0x6f] ss:$-1 sm:$0xff]  ;;  %v167_v39 = vld [vmem:[#allocation0 + $0x7f] ss:$-1 sm:$0xff] }
   0xe   :  { %116 = vst.msk [vmem:[#allocation1 + $0x18] sm:$0xff] %vm73_vm0, %v112_v33  ;;  %v154_v40 = vrot.slane %v153_v38, 1  ;;  %v168_v41 = vrot.slane %v167_v39, 1  ;;  %130 = vst.msk [vmem:[#allocation1 + $0x20] sm:$0xff] %vm73_vm0, %v126_v36 }
   0xf   :  { %144 = vst.msk [vmem:[#allocation1 + $0x28] sm:$0xff] %vm73_vm0, %v140_v37 }
  0x10   :  { %158 = vst.msk [vmem:[#allocation1 + $0x30] sm:$0xff] %vm73_vm0, %v154_v40  ;;  %172 = vst.msk [vmem:[#allocation1 + $0x38] sm:$0xff] %vm73_vm0, %v168_v41 }
  0x13   :  { %v214_v42 = vld [vmem:[#allocation1] sm:$0xff]  ;;  %v216_v43 = vld [vmem:[#allocation1 + $0x8] sm:$0xff] }
  0x14   :  { %v218_v44 = vld [vmem:[#allocation1 + $0x10] sm:$0xff]  ;;  %215 = vst [vmem:[%s330_s1] sm:$0xff] %v214_v42  ;;  %217 = vst [vmem:[%s330_s1 + $0x8] sm:$0xff] %v216_v43 }
  0x15   :  { %219 = vst [vmem:[%s330_s1 + $0x10] sm:$0xff] %v218_v44  ;;  %v220_v45 = vld [vmem:[#allocation1 + $0x18] sm:$0xff]  ;;  %v222_v46 = vld [vmem:[#allocation1 + $0x20] sm:$0xff] }
  0x16   :  { %221 = vst [vmem:[%s330_s1 + $0x18] sm:$0xff] %v220_v45  ;;  %v224_v47 = vld [vmem:[#allocation1 + $0x28] sm:$0xff]  ;;  %223 = vst [vmem:[%s330_s1 + $0x20] sm:$0xff] %v222_v46 }
  0x17   :  { %225 = vst [vmem:[%s330_s1 + $0x28] sm:$0xff] %v224_v47  ;;  %v226_v48 = vld [vmem:[#allocation1 + $0x30] sm:$0xff]  ;;  %v228_v49 = vld [vmem:[#allocation1 + $0x38] sm:$0xff] }
  0x18   :  { %227 = vst [vmem:[%s330_s1 + $0x30] sm:$0xff] %v226_v48  ;;  %229 = vst [vmem:[%s330_s1 + $0x38] sm:$0xff] %v228_v49 }

// kernel: spectral_conv2d.1
= control target key start
LH: loop header
LB: loop body
LE: loop exit
PB: predicated region body
PF: predicated region fallthrough
CT: control target
= control target key end

     0   :  { %s385_s0 = inlined_call_operand.vmem [shape: f32[4,2,128], index: 0, kind: input, shape index: {}]   ;;  %s386_s1 = inlined_call_operand.vmem [shape: f32[4,2,128], index: 1, kind: input, shape index: {}]   ;;  %s387_s2 = inlined_call_operand.vmem [shape: f32[4,4,128], index: 2, kind: input, shape index: {}]   ;;  %s388_s3 = inlined_call_operand.vmem [shape: f32[4,4,128], index: 3, kind: input, shape index: {}]   ;;  %s389_s4 = inlined_call_operand.vmem [shape: f32[2,4,128], index: 4, kind: output, shape index: {0}]   ;;  %s390_s5 = inlined_call_operand.vmem [shape: f32[2,4,128], index: 5, kind: output, shape index: {1}]  }
   0x1   :  { %v205_v0 = vld [vmem:[%s385_s0] ss:$0 sm:$0xff]  ;;  %v211_v5 = vld [vmem:[%s385_s0 + $0x2] ss:$0 sm:$0xff]  ;;  %v209_v9 = vld [vmem:[%s387_s2 + $0x4] sm:$0xf] }
   0x2   :  { %v206_v1 = vld [vmem:[%s386_s1] ss:$0 sm:$0xff]  ;;  %v212_v6 = vld [vmem:[%s386_s1 + $0x2] ss:$0 sm:$0xff]  ;;  %v210_v10 = vld [vmem:[%s388_s3 + $0x4] sm:$0xf]  ;;  %v51_v13 = vmul.f32 %v211_v5, %v209_v9 }
   0x3   :  { %v21_v2 = vld [vmem:[%s387_s2] sm:$0xf]  ;;  %v217_v11 = vld [vmem:[%s385_s0 + $0x4] ss:$0 sm:$0xff]  ;;  %v56_v14 = vmul.f32 %v212_v6, %v210_v10  ;;  %v215_v16 = vld [vmem:[%s387_s2 + $0x8] sm:$0xf]  ;;  %v59_v18 = vmul.f32 %v211_v5, %v210_v10  ;;  %v60_v19 = vmul.f32 %v212_v6, %v209_v9 }
   0x4   :  { %v22_v3 = vld [vmem:[%s388_s3] sm:$0xf]  ;;  %v27_v4 = vmul.f32 %v205_v0, %v21_v2  ;;  %v36_v7 = vmul.f32 %v206_v1, %v21_v2  ;;  %v218_v15 = vld [vmem:[%s386_s1 + $0x4] ss:$0 sm:$0xff]  ;;  %v216_v17 = vld [vmem:[%s388_s3 + $0x8] sm:$0xf]  ;;  %v75_v21 = vmul.f32 %v217_v11, %v215_v16 }
   0x5   :  { %v32_v8 = vmul.f32 %v206_v1, %v22_v3  ;;  %v35_v12 = vmul.f32 %v205_v0, %v22_v3  ;;  %v80_v22 = vmul.f32 %v218_v15, %v216_v17  ;;  %v223_v23 = vld [vmem:[%s385_s0 + $0x6] ss:$0 sm:$0xff]  ;;  %v221_v25 = vld [vmem:[%s387_s2 + $0xc] sm:$0xf]  ;;  %v57_v27 = vsub.f32 %v51_v13, %v56_v14  ;;  %v225_v32 = vld [vmem:[%s385_s0 + $0x1] ss:$0 sm:$0xff] }
   0x6   :  { %v224_v24 = vld [vmem:[%s386_s1 + $0x6] ss:$0 sm:$0xff]  ;;  %v222_v28 = vld [vmem:[%s388_s3 + $0xc] sm:$0xf]  ;;  %v99_v29 = vmul.f32 %v223_v23, %v221_v25  ;;  %v61_v30 = vadd.f32 %v60_v19, %v59_v18  ;;  %v83_v31 = vmul.f32 %v217_v11, %v216_v17  ;;  %v226_v33 = vld [vmem:[%s386_s1 + $0x1] ss:$0 sm:$0xff]  ;;  %v84_v36 = vmul.f32 %v218_v15, %v215_v16 }
   0x7   :  { %v33_v20 = vsub.f32 %v27_v4, %v32_v8  ;;  %v37_v26 = vadd.f32 %v36_v7, %v35_v12  ;;  %v81_v34 = vsub.f32 %v75_v21, %v80_v22  ;;  %v104_v35 = vmul.f32 %v224_v24, %v222_v28  ;;  %v115_v38 = vld [vmem:[%s387_s2] sm:$0xf]  ;;  %v229_v46 = vld [vmem:[%s387_s2 + $0x4] sm:$0xf]  ;;  %v235_v54 = vld [vmem:[%s387_s2 + $0x8] sm:$0xf] }
   0x8   :  { %v107_v37 = vmul.f32 %v223_v23, %v222_v28  ;;  %v116_v39 = vld [vmem:[%s388_s3] sm:$0xf]  ;;  %v108_v43 = vmul.f32 %v224_v24, %v221_v25  ;;  %v121_v44 = vmul.f32 %v225_v32, %v115_v38  ;;  %v230_v47 = vld [vmem:[%s388_s3 + $0x4] sm:$0xf]  ;;  %v85_v49 = vadd.f32 %v84_v36, %v83_v31  ;;  %v236_v58 = vld [vmem:[%s388_s3 + $0x8] sm:$0xf] }
   0x9   :  { %v231_v40 = vld [vmem:[%s385_s0 + $0x3] ss:$0 sm:$0xff]  ;;  %v58_v41 = vadd.f32 %v57_v27, %v33_v20  ;;  %v62_v42 = vadd.f32 %v61_v30, %v37_v26  ;;  %v105_v48 = vsub.f32 %v99_v29, %v104_v35  ;;  %v126_v50 = vmul.f32 %v226_v33, %v116_v39  ;;  %v237_v52 = vld [vmem:[%s385_s0 + $0x5] ss:$0 sm:$0xff]  ;;  %v243_v60 = vld [vmem:[%s385_s0 + $0x7] ss:$0 sm:$0xff] }
   0xa   :  { %v232_v45 = vld [vmem:[%s386_s1 + $0x3] ss:$0 sm:$0xff]  ;;  %v141_v51 = vmul.f32 %v231_v40, %v229_v46  ;;  %v238_v53 = vld [vmem:[%s386_s1 + $0x5] ss:$0 sm:$0xff]  ;;  %v109_v56 = vadd.f32 %v108_v43, %v107_v37  ;;  %v161_v59 = vmul.f32 %v237_v52, %v235_v54  ;;  %v244_v61 = vld [vmem:[%s386_s1 + $0x7] ss:$0 sm:$0xff]  ;;  %v129_v3 = vmul.f32 %v225_v32, %v116_v39 }
   0xb   :  { %v82_v55 = vadd.f32 %v81_v34, %v58_v41  ;;  %v146_v57 = vmul.f32 %v232_v45, %v230_v47  ;;  %v86_v62 = vadd.f32 %v85_v49, %v62_v42  ;;  %v127_v63 = vsub.f32 %v121_v44, %v126_v50  ;;  %v241_v1 = vld [vmem:[%s387_s2 + $0xc] sm:$0xf] }
   0xc   :  { %v166_v0 = vmul.f32 %v238_v53, %v236_v58  ;;  %v242_v2 = vld [vmem:[%s388_s3 + $0xc] sm:$0xf]  ;;  %v181_v6 = vmul.f32 %v243_v60, %v241_v1  ;;  %v130_v10 = vmul.f32 %v226_v33, %v115_v38  ;;  %v149_v11 = vmul.f32 %v231_v40, %v230_v47 }
   0xd   :  { %v106_v4 = vadd.f32 %v105_v48, %v82_v55  ;;  %v147_v5 = vsub.f32 %v141_v51, %v146_v57  ;;  %v186_v7 = vmul.f32 %v244_v61, %v242_v2  ;;  %v110_v8 = vadd.f32 %v109_v56, %v86_v62 }
   0xe   :  { %v167_v9 = vsub.f32 %v161_v59, %v166_v0  ;;  %v150_v14 = vmul.f32 %v232_v45, %v229_v46  ;;  %v169_v15 = vmul.f32 %v237_v52, %v236_v58  ;;  %v131_v16 = vadd.f32 %v130_v10, %v129_v3 }
   0xf   :  { %111 = vst [vmem:[%s389_s4] sm:$0xf] %v106_v4  ;;  %v148_v12 = vadd.f32 %v147_v5, %v127_v63  ;;  %v187_v13 = vsub.f32 %v181_v6, %v186_v7  ;;  %112 = vst [vmem:[%s390_s5] sm:$0xf] %v110_v8  ;;  %v170_v17 = vmul.f32 %v238_v53, %v235_v54 }
  0x10   :  { %v189_v18 = vmul.f32 %v243_v60, %v242_v2  ;;  %v190_v19 = vmul.f32 %v244_v61, %v241_v1  ;;  %v151_v21 = vadd.f32 %v150_v14, %v149_v11 }
  0x11   :  { %v168_v20 = vadd.f32 %v167_v9, %v148_v12  ;;  %v171_v22 = vadd.f32 %v170_v17, %v169_v15 }
  0x12   :  { %v152_v24 = vadd.f32 %v151_v21, %v131_v16  ;;  %v191_v25 = vadd.f32 %v190_v19, %v189_v18 }
  0x13   :  { %v188_v23 = vadd.f32 %v187_v13, %v168_v20 }
  0x14   :  { %v172_v26 = vadd.f32 %v171_v22, %v152_v24 }
  0x15   :  { %245 = vst [vmem:[%s389_s4 + $0x4] sm:$0xf] %v188_v23 }
  0x16   :  { %v192_v27 = vadd.f32 %v191_v25, %v172_v26 }
  0x18   :  { %246 = vst [vmem:[%s390_s5 + $0x4] sm:$0xf] %v192_v27 }

</bundles_post_ra>
